<compile_context>
chip_gen: v6e
topology: v6e:2x2x1
jax: 0.10.0
libtpu: 0.0.40
codegen_flags: <defaults>
</compile_context>

<pallas_src>
import functools

import jax
import jax.numpy as jnp
from jax import lax
from jax.experimental import pallas as pl
from jax.experimental.pallas import tpu as pltpu


def _round_up(x, m):
    return (x + m - 1) // m * m


def _sep_conv_kernel(x_ref, w1_ref, w2_ref, o_ref, *, K, Wps, tile_h):
    # x_ref : (1, (tile_h + K) * Wps, C)   halo window, flattened rows, zero padded
    # w1_ref: (K, C)                       depthwise vertical taps (f32)
    # w2_ref: (K*C, OC_pad)                im2col horizontal weights (f32 or bf16)
    # o_ref : (1, tile_h * Wps, OC_pad)
    Lo = tile_h * Wps            # flattened output elements in this tile
    Ly = (tile_h + 1) * Wps      # conv1 output needed (one extra row covers the kw shifts)

    x = x_ref[0]                 # (L_in, C), f32

    # conv1: depthwise vertical conv.  A shift of kh rows == shift of kh*Wps in the
    # flattened axis; Wps % 8 == 0 so every slice start is sublane aligned.
    y = w1_ref[0:1, :] * x[0:Ly, :]
    for kh in range(1, K):
        y = y + w1_ref[kh:kh + 1, :] * x[kh * Wps: kh * Wps + Ly, :]

    # conv2: im2col along the lane axis -> a single MXU matmul with a K*C contraction
    # (the unaligned +1/+2 sublane shifts are paid once here instead of per matmul).
    ycat = jnp.concatenate([y[kw:kw + Lo, :] for kw in range(K)], axis=1)   # (Lo, K*C)
    acc = jnp.dot(ycat.astype(w2_ref.dtype), w2_ref[...],
                  preferred_element_type=jnp.float32)                       # (Lo, OC_pad)
    o_ref[0] = acc.astype(o_ref.dtype)


def _choose_tile_h(Hout, Wps, C, OC_pad, K, budget_bytes=12 * 1024 * 1024):
    """Largest output-row tile whose double-buffered input+output blocks stay well inside
    the default 32 MiB scoped-VMEM limit (and v7x's 64 MiB physical VMEM)."""
    per_row = 2 * 4 * Wps * (C + OC_pad)      # 2 pipeline buffers, f32, input + output rows
    fixed = 2 * 4 * K * Wps * C               # halo rows
    t = max(1, (budget_bytes - fixed) // per_row)
    return int(max(1, min(Hout, t, 128)))


def spatial_separable_conv2d(x, w1, w2, padding, *, tile_h=None,
                             matmul_dtype=jnp.bfloat16):
    """x: (N, C, H, W) f32 (NCHW).  w1: (C,1,K,1) depthwise weight.  w2: (OC,C,1,K).
    Returns (N, OC, Hout, Wout), matching SpatialSeparableConv2d.forward (bias=False)."""
    N, C, H, W = x.shape
    OC, C2, one, K = w2.shape
    assert C2 == C and one == 1
    pad = padding

    Hp, Wp = H + 2 * pad, W + 2 * pad          # conv1 pads H, conv2 pads W
    Hout, Wout = Hp - K + 1, Wp - K + 1
    assert Hout >= 1 and Wout >= 1

    Wps = _round_up(Wp, 8)                     # aligned flattened row stride
    OC_pad = _round_up(OC, 128)                # lane-dense output stores

    if tile_h is None:
        tile_h = _choose_tile_h(Hout, Wps, C, OC_pad, K)
    tile_h = int(min(tile_h, Hout))
    n_tiles = -(-Hout // tile_h)
    Hout_pad = n_tiles * tile_h
    Hp_ext = Hout_pad + K                      # rows so every halo window stays in bounds
    L_in = (tile_h + K) * Wps
    Lo = tile_h * Wps

    x = x.astype(jnp.float32)

    # ---- wrapper-side layout: one transpose, one merged pad, one halo gather.
    x_nhwc = jnp.transpose(x, (0, 2, 3, 1))                               # (N, H, W, C)
    xp = jnp.pad(x_nhwc, ((0, 0),
                          (pad, Hp_ext - H - pad),
                          (pad, Wps - W - pad),
                          (0, 0)))                                        # (N, Hp_ext, Wps, C)
    row_ids = (jnp.arange(n_tiles)[:, None] * tile_h
               + jnp.arange(tile_h + K)[None, :])                         # (n_tiles, tile_h+K)
    xg = xp[:, row_ids].reshape(N, n_tiles * L_in, C)                     # halo windows

    # ---- weight re-layouts.
    w1k = w1.reshape(C, K).T.astype(jnp.float32)                          # (K, C)
    w2k = w2.reshape(OC, C, K).transpose(2, 1, 0).reshape(K * C, OC)      # (K*C, OC)
    if OC_pad != OC:
        w2k = jnp.pad(w2k, ((0, 0), (0, OC_pad - OC)))
    w2k = w2k.astype(matmul_dtype)

    kernel = functools.partial(_sep_conv_kernel, K=K, Wps=Wps, tile_h=tile_h)

    Ly_rows = (tile_h + 1) * Wps
    flops = 2 * N * n_tiles * (Ly_rows * K * C + Lo * K * C * OC_pad)
    bytes_accessed = (xg.size * 4 + w1k.size * 4
                      + w2k.size * jnp.dtype(matmul_dtype).itemsize
                      + N * Hout_pad * Wps * OC_pad * 4)

    out_flat = pl.pallas_call(
        kernel,
        out_shape=jax.ShapeDtypeStruct((N, Hout_pad * Wps, OC_pad), jnp.float32),
        grid=(N, n_tiles),
        in_specs=[
            pl.BlockSpec((1, L_in, C), lambda n, t: (n, t, 0)),
            pl.BlockSpec((K, C), lambda n, t: (0, 0)),           # constant weights: index
            pl.BlockSpec((K * C, OC_pad), lambda n, t: (0, 0)),  # maps never change -> no re-DMA
        ],
        out_specs=pl.BlockSpec((1, Lo, OC_pad), lambda n, t: (n, t, 0)),
        compiler_params=pltpu.CompilerParams(
            dimension_semantics=("parallel", "parallel")),
        cost_estimate=pl.CostEstimate(flops=int(flops), transcendentals=0,
                                      bytes_accessed=int(bytes_accessed)),
    )(xg, w1k, w2k)

    # Rows are Wps wide; only the first Wout cols / Hout rows / OC channels are valid.
    out = out_flat.reshape(N, Hout_pad, Wps, OC_pad)[:, :Hout, :Wout, :OC]
    return out.transpose(0, 3, 1, 2)


def _reference(x, w1, w2, padding):
    dn = ("NCHW", "OIHW", "NCHW")
    C = x.shape[1]
    y = lax.conv_general_dilated(x, w1, (1, 1), [(padding, padding), (0, 0)],
                                 dimension_numbers=dn, feature_group_count=C)
    return lax.conv_general_dilated(y, w2, (1, 1), [(0, 0), (padding, padding)],
                                    dimension_numbers=dn)


if __name__ == "__main__":
    N, C, OC, H, W = 2, 8, 16, 16, 16
    K, pad = 3, 1

    key = jax.random.PRNGKey(0)
    kx, k1, k2 = jax.random.split(key, 3)
    x = jax.random.normal(kx, (N, C, H, W), dtype=jnp.float32)
    # deterministic synthetic parameters (bias=False in the module)
    w1 = jax.random.normal(k1, (C, 1, K, 1), dtype=jnp.float32) * 0.3
    w2 = jax.random.normal(k2, (OC, C, 1, K), dtype=jnp.float32) * 0.2

    ref = _reference(x, w1, w2, pad)

    # f32 MXU path, tile_h dividing Hout (2 row tiles per image) -> tight tolerance.
    out_f32 = spatial_separable_conv2d(x, w1, w2, pad, tile_h=8,
                                       matmul_dtype=jnp.float32)
    out_f32 = jax.block_until_ready(out_f32)
    assert out_f32.shape == ref.shape, (out_f32.shape, ref.shape)
    assert jnp.allclose(out_f32, ref, atol=1e-4, rtol=1e-4), \
        float(jnp.max(jnp.abs(out_f32 - ref)))

    # default bf16 MXU path, non-dividing tile (exercises the padded last row tile).
    out_bf16 = spatial_separable_conv2d(x, w1, w2, pad, tile_h=6)
    out_bf16 = jax.block_until_ready(out_bf16)
    assert out_bf16.shape == ref.shape, (out_bf16.shape, ref.shape)
    assert jnp.allclose(out_bf16, ref, atol=5e-2, rtol=5e-2), \
        float(jnp.max(jnp.abs(out_bf16 - ref)))

    print("KERNEL_OK")
</pallas_src>

<mosaic_0001>
module attributes {stable_mosaic.version = 11 : i64} {
  func.func @_sep_conv_kernel(%arg0: i32, %arg1: i32, %arg2: memref<1x264x8xf32, #tpu.memory_space<vmem>>, %arg3: memref<3x8xf32, #tpu.memory_space<vmem>>, %arg4: memref<24x128xf32, #tpu.memory_space<vmem>>, %arg5: memref<1x192x128xf32, #tpu.memory_space<vmem>>) attributes {dimension_semantics = [#tpu.dimension_semantics<parallel>, #tpu.dimension_semantics<parallel>], iteration_bounds = array<i64: 2, 2>, scalar_prefetch = 0 : i64, scratch_operands = 0 : i64, tpu.core_type = #tpu.core_type<tc>, window_params = [{transform_indices = @transform_0, window_bounds = array<i64: 1, 264, 8>}, {pipeline_mode = #tpu.pipeline_mode<synchronous>, transform_indices = @transform_1, window_bounds = array<i64: 3, 8>}, {pipeline_mode = #tpu.pipeline_mode<synchronous>, transform_indices = @transform_2, window_bounds = array<i64: 24, 128>}, {transform_indices = @transform_3, window_bounds = array<i64: 1, 192, 128>}]} {
    %c0 = arith.constant 0 : index
    %c0_0 = arith.constant 0 : index
    %c0_1 = arith.constant 0 : index
    %0 = vector.load %arg2[%c0, %c0_0, %c0_1] : memref<1x264x8xf32, #tpu.memory_space<vmem>>, vector<1x264x8xf32>
    %1 = vector.shape_cast %0 : vector<1x264x8xf32> to vector<264x8xf32>
    %c0_2 = arith.constant 0 : index
    %c0_3 = arith.constant 0 : index
    %2 = vector.load %arg3[%c0_2, %c0_3] : memref<3x8xf32, #tpu.memory_space<vmem>>, vector<1x8xf32>
    %3 = vector.extract_strided_slice %1 {offsets = [0, 0], sizes = [216, 8], strides = [1, 1]} : vector<264x8xf32> to vector<216x8xf32>
    %4 = vector.broadcast %2 : vector<1x8xf32> to vector<216x8xf32>
    %5 = arith.mulf %4, %3 : vector<216x8xf32>
    %c1 = arith.constant 1 : index
    %c0_4 = arith.constant 0 : index
    %6 = vector.load %arg3[%c1, %c0_4] : memref<3x8xf32, #tpu.memory_space<vmem>>, vector<1x8xf32>
    %7 = vector.extract_strided_slice %1 {offsets = [24, 0], sizes = [216, 8], strides = [1, 1]} : vector<264x8xf32> to vector<216x8xf32>
    %8 = vector.broadcast %6 : vector<1x8xf32> to vector<216x8xf32>
    %9 = arith.mulf %8, %7 : vector<216x8xf32>
    %10 = arith.addf %5, %9 : vector<216x8xf32>
    %c2 = arith.constant 2 : index
    %c0_5 = arith.constant 0 : index
    %11 = vector.load %arg3[%c2, %c0_5] : memref<3x8xf32, #tpu.memory_space<vmem>>, vector<1x8xf32>
    %12 = vector.extract_strided_slice %1 {offsets = [48, 0], sizes = [216, 8], strides = [1, 1]} : vector<264x8xf32> to vector<216x8xf32>
    %13 = vector.broadcast %11 : vector<1x8xf32> to vector<216x8xf32>
    %14 = arith.mulf %13, %12 : vector<216x8xf32>
    %15 = arith.addf %10, %14 : vector<216x8xf32>
    %16 = vector.extract_strided_slice %15 {offsets = [0, 0], sizes = [192, 8], strides = [1, 1]} : vector<216x8xf32> to vector<192x8xf32>
    %17 = vector.extract_strided_slice %15 {offsets = [1, 0], sizes = [192, 8], strides = [1, 1]} : vector<216x8xf32> to vector<192x8xf32>
    %18 = vector.extract_strided_slice %15 {offsets = [2, 0], sizes = [192, 8], strides = [1, 1]} : vector<216x8xf32> to vector<192x8xf32>
    %19 = tpu.concatenate %16, %17, %18 in 1 : vector<192x8xf32>, vector<192x8xf32>, vector<192x8xf32> -> vector<192x24xf32>
    %c0_6 = arith.constant 0 : index
    %c0_7 = arith.constant 0 : index
    %20 = vector.load %arg4[%c0_6, %c0_7] : memref<24x128xf32, #tpu.memory_space<vmem>>, vector<24x128xf32>
    %cst = arith.constant dense<0.000000e+00> : vector<192x128xf32>
    %21 = tpu.matmul %19, %20, %cst {dimension_numbers = #tpu.dot_dimension_numbers<[1], [0], [0], [1], [0, 0, 1, 1], [], []>} : vector<192x24xf32>, vector<24x128xf32>, vector<192x128xf32> -> vector<192x128xf32>
    %c0_8 = arith.constant 0 : index
    %c0_9 = arith.constant 0 : index
    %c0_10 = arith.constant 0 : index
    %22 = vector.load %arg5[%c0_8, %c0_9, %c0_10] : memref<1x192x128xf32, #tpu.memory_space<vmem>>, vector<1x192x128xf32>
    %23 = vector.shape_cast %22 : vector<1x192x128xf32> to vector<192x128xf32>
    %24 = vector.shape_cast %21 : vector<192x128xf32> to vector<1x192x128xf32>
    tpu.vector_store %arg5[%c0_8, %c0_9, %c0_10], %24 {strides = array<i32>} : memref<1x192x128xf32, #tpu.memory_space<vmem>>, vector<1x192x128xf32>,
    return
  }
  func.func @transform_0(%arg0: i32, %arg1: i32) -> (i32, i32, i32) {
    %c0_i32 = arith.constant 0 : i32
    %c0_i32_0 = arith.constant 0 : i32
    return %arg0, %arg1, %c0_i32 : i32, i32, i32
  }
  func.func @transform_1(%arg0: i32, %arg1: i32) -> (i32, i32) {
    %c0_i32 = arith.constant 0 : i32
    %c0_i32_0 = arith.constant 0 : i32
    %c0_i32_1 = arith.constant 0 : i32
    return %c0_i32, %c0_i32_0 : i32, i32
  }
  func.func @transform_2(%arg0: i32, %arg1: i32) -> (i32, i32) {
    %c0_i32 = arith.constant 0 : i32
    %c0_i32_0 = arith.constant 0 : i32
    %c0_i32_1 = arith.constant 0 : i32
    return %c0_i32, %c0_i32_0 : i32, i32
  }
  func.func @transform_3(%arg0: i32, %arg1: i32) -> (i32, i32, i32) {
    %c0_i32 = arith.constant 0 : i32
    %c0_i32_0 = arith.constant 0 : i32
    return %arg0, %arg1, %c0_i32 : i32, i32, i32
  }
}

</mosaic_0001>

<bundles_post_ra>
// kernel: tpu_custom_call.1
= control target key start
LH: loop header
LB: loop body
LE: loop exit
PB: predicated region body
PF: predicated region fallthrough
CT: control target
= control target key end

     0   :  { %8 = vsyncpa [#allocation3], 0  ;;  %s2108_s0 = inlined_call_operand.vmem [shape: f32[2,528,8], index: 0, kind: input, shape index: {}]   ;;  %s2109_s1 = inlined_call_operand.vmem [shape: f32[3,8], index: 1, kind: input, shape index: {}]   ;;  %s2110_s2 = inlined_call_operand.vmem [shape: f32[24,128], index: 2, kind: input, shape index: {}]   ;;  %s2111_s3 = inlined_call_operand.hbm [shape: f32[2,384,128], index: 3, kind: output, shape index: {}]  }
   0x1   :  { %10 = vsyncpa [#allocation3 + $0x1], 0  ;;  %s1379_s12 = smov 0   ;;  %s1381_s13 = smov 0  }
   0x2   :  { %s1383_s14 = smov 0   ;;  %s1385_s15 = smov 0  }
   0x3   :  { %s1387_s16 = smov 0   ;;  %s1389_s17 = smov 0  }
   0x4   :  { %s1391_s18 = smov 0   ;;  %s1393_s19 = smov 0  }
   0x5 LB: > { %s1073_s20 = sadd.s32 4294967295, %s1353_s19   ;;  %s1074_s21 = sadd.s32 4294967294, %s1353_s19   ;;  %s1353_s19 = sphi %s1393_s19, %s16_s19   ;;  %s1349_s18 = sphi %s1391_s18, %s2120_s18   ;;  %s1345_s17 = sphi %s1389_s17, %s2119_s17   ;;  %s1341_s16 = sphi %s1387_s16, %s2118_s16   ;;  %s1337_s15 = sphi %s1385_s15, %s2117_s15   ;;  %s1333_s14 = sphi %s1383_s14, %s2116_s14   ;;  %s1329_s13 = sphi %s1381_s13, %s2115_s13   ;;  %s1325_s12 = sphi %s1379_s12, %s2114_s12  }
   0x6   : > { %s25_s22 = sadd.s32 1, %s1345_s17  ;;  %s28_s23 = sadd.s32 1, %s1349_s18 }
   0x7   : > { %p26_p0 = scmp.ge.s32.totalorder %s25_s22, 2  ;;  %p117_p1 = scmp.ne.s32.totalorder %s1333_s14, %s1329_s13 }
   0x8   : > { %p118_p2 = scmp.eq.s32.totalorder %s1073_s20, 3  ;;  %p123_p5 = scmp.ne.s32.totalorder %s1329_s13, %s1325_s12 }
   0x9   : > { %s2122_s22 = smov (%p26_p0, %s25_s22), 0  ;;  %s2124_s23 = smov (!%p26_p0, %s28_s23), %s1349_s18 }
   0xa   : > { %s103_s24 = ssub.s32 %s1345_s17, %s2122_s22  ;;  %p1430_p3 = por %p118_p2, %p117_p1 }
   0xb   : > { %p30_p4 = scmp.ge.s32.totalorder %s2124_s23, 2  ;;  %p124_p6 = scmp.eq.s32.totalorder %s1074_s21, 3 }
   0xc   : > { %p1077_p7 = scmp.ge.s32.totalorder %s1353_s19, 1  ;;  %p161_p9 = scmp.lt.s32.totalorder %s1353_s19, 5 }
   0xd   : > { %s2126_s23 = smov (%p30_p4, %s2124_s23), 0  ;;  %p1439_p8 = por %p124_p6, %p123_p5 }
   0xe   : > { %s102_s27 = ssub.s32 %s1349_s18, %s2126_s23  ;;  %s107_s28 = sadd.s32 1, %s1333_s14 }
   0xf   : > { %s104_s29 = sor.u32 %s103_s24, %s102_s27  ;;  %p162_p10 = pnand %p1077_p7, %p161_p9 }
  0x10   : > { %p105_p11 = scmp.eq.s32.totalorder %s104_s29, 0  ;;  %s189_s4 = smul.u32 (!%p162_p10), 33, %s1337_s15 }
  0x11   : > { %165 = sbr.rel (%p162_p10) target bundleno = 458 (0x1ca), region = 32  ;;  %p190_p12 = scmp.lt.s32.totalorder (!%p162_p10), %s1341_s16, 1 }
  0x12   : > { %s1448_s30 = scalar_select %p105_p11, %s1333_s14, %s107_s28  }
  0x13   : > { %p192_p13 = scmp.lt.s32.totalorder (!%p162_p10), %s189_s4, 65  ;;  %s1356_s11 = smov (!%p162_p10), 16  }
  0x14   : > { %s186_s20 = sand.u32 (!%p162_p10), 1, %s1329_s13   ;;  %s1186_s28 = smul.u32 (!%p162_p10), 48, %s1341_s16 }
  0x15   : > { %s1184_s21 = smul.u32 (!%p162_p10), 192, %s186_s20  ;;  %s1357_s10 = smov (!%p162_p10), [#allocation2]  }
  0x16   : > { %s191_s5 = scalar_select %p190_p12, %s1341_s16, 1  ;;  %v1456_v0 = vld [vmem:[%s2109_s1] ss:$0 sm:$0xff]  ;;  %v1461_v1 = vld [vmem:[%s2109_s1 + $0x1] ss:$0 sm:$0xff]  ;;  %vm396_vm0 = vcmask 1046528  }
  0x17   : > { %s2128_s4 = smov (!%p192_p13, %s189_s4), 65  ;;  %v1471_v2 = vld [vmem:[%s2109_s1 + $0x2] ss:$0 sm:$0xff]  ;;  %vm518_vm1 = vcmask 1045504   ;;  %v692_v58 = vld [vmem:[%s2110_s2 + $0x10] sm:$0xff]  ;;  %v691_v63 = vld [vmem:[%s2110_s2 + $0x8] sm:$0xff] }
  0x18   : > { %s1185_s6 = smul.u32 66, %s191_s5  ;;  %1136 = vmatprep.subr.mxu0 %v692_v58  ;;  %1178 = vmatprep.subr.mxu1 %v692_v58  ;;  %vm640_vm2 = vcmask 64512   ;;  %vm665_vm3 = vcmask 130048   ;;  %vm693_vm4 = vcmask 195584   ;;  %s2018_s24 = scalar_lea.vmem [#allocation2], %s1184_s21 }
  0x19   : > { %1137 = vmatpush3.msra.mxu0 %v692_v58  ;;  %1181 = vmatpush3.msra.mxu1 %v692_v58 }
  0x1a   : > { %s195_s7 = sadd.s32 %s1185_s6, %s2128_s4  ;;  %s1355_s6 = smov 8   ;;  %1138 = vmatprep.subr.mxu0 %v691_v63  ;;  %1179 = vmatprep.subr.mxu1 %v691_v63 }
  0x1b   : > { %s1078_s8 = sshll.u32 %s195_s7, 3  ;;  %1139 = vmatpush3.msra.mxu0 %v691_v63  ;;  %1182 = vmatpush3.msra.mxu1 %v691_v63  ;;  %s991_s4 = sshll.u32 %s2018_s24, 4  ;;  %s2044_s4 = int_to_ptr.vmem [resolvable:$true] %s991_s4 }
  0x1c   : > { %s1466_s27 = scalar_lea.vmem %s2108_s0, %s1078_s8  ;;  %s1261_s16 = scalar_lea.vmem %s2044_s4, 3072 }
  0x1d   : > { %v201_v3 = vld [vmem:[%s1466_s27 + $0x8] sm:$0xff]  ;;  %v202_v4 = vld [vmem:[%s1466_s27 + $0x10] sm:$0xff]  ;;  %v204_v5 = vld [vmem:[%s1466_s27 + $0x20] sm:$0xff]  ;;  %p1262_p0 = scmp.ne.s32.totalorder %s2044_s4, %s1261_s16 }
  0x1e   : > { %v1477_v6 = vld [vmem:[%s1466_s27 + $0x28] sm:$0xff]  ;;  %v1480_v7 = vld [vmem:[%s1466_s27 + $0x38] sm:$0xff]  ;;  %v1483_v8 = vld [vmem:[%s1466_s27 + $0x40] sm:$0xff]  ;;  %v237_v9 = vmul.f32 %v1456_v0, %v201_v3  ;;  %v238_v10 = vmul.f32 %v1456_v0, %v202_v4  ;;  %v267_v11 = vmul.f32 %v1461_v1, %v204_v5  ;;  %v240_v56 = vmul.f32 %v1456_v0, %v204_v5 }
  0x1f   : > { %v268_v12 = vmul.f32 %v1461_v1, %v1477_v6  ;;  %v322_v13 = vmul.f32 %v1471_v2, %v1480_v7  ;;  %v323_v14 = vmul.f32 %v1471_v2, %v1483_v8  ;;  %v200_v15 = vld [vmem:[%s1466_s27] sm:$0xff]  ;;  %v1496_v16 = vld [vmem:[%s1466_s27 + $0x18] sm:$0xff]  ;;  %v1499_v17 = vld [vmem:[%s1466_s27 + $0x30] sm:$0xff]  ;;  %v270_v57 = vmul.f32 %v1461_v1, %v1480_v7  ;;  %p1263_p1 = pnand %p1262_p0, %p1430_p3 }
  0x20   : > { %v292_v18 = vadd.f32 %v267_v11, %v237_v9  ;;  %v236_v19 = vmul.f32 %v1456_v0, %v200_v15  ;;  %v266_v20 = vmul.f32 %v1461_v1, %v1496_v16  ;;  %v321_v21 = vmul.f32 %v1471_v2, %v1499_v17  ;;  %v1507_v22 = vld [vmem:[%s1466_s27 + $0x68] sm:$0xff]  ;;  %v1510_v23 = vld [vmem:[%s1466_s27 + $0x70] sm:$0xff]  ;;  %v1513_v24 = vld [vmem:[%s1466_s27 + $0x80] sm:$0xff] }
  0x21   : > { %v293_v25 = vadd.f32 %v268_v12, %v238_v10  ;;  %v1516_v26 = vld [vmem:[%s1466_s27 + $0x88] sm:$0xff]  ;;  %v1519_v27 = vld [vmem:[%s1466_s27 + $0x98] sm:$0xff]  ;;  %v1522_v28 = vld [vmem:[%s1466_s27 + $0xa0] sm:$0xff]  ;;  %v249_v29 = vmul.f32 %v1456_v0, %v1507_v22  ;;  %v250_v30 = vmul.f32 %v1456_v0, %v1510_v23  ;;  %v279_v31 = vmul.f32 %v1461_v1, %v1513_v24  ;;  %p1264_p2 = pneg %p1263_p1 }
  0x22   : > { %v1530_v32 = vadd.f32 %v322_v13, %v292_v18  ;;  %v291_v33 = vadd.f32 %v266_v20, %v236_v19  ;;  %v280_v34 = vmul.f32 %v1461_v1, %v1516_v26  ;;  %v334_v35 = vmul.f32 %v1471_v2, %v1519_v27  ;;  %v1537_v36 = vld [vmem:[%s1466_s27 + $0x60] sm:$0xff]  ;;  %v1540_v37 = vld [vmem:[%s1466_s27 + $0x78] sm:$0xff]  ;;  %v1543_v38 = vld [vmem:[%s1466_s27 + $0x90] sm:$0xff] }
  0x23   : > { %v1545_v39 = vadd.f32 %v323_v14, %v293_v25  ;;  %v304_v40 = vadd.f32 %v279_v31, %v249_v29  ;;  %v335_v41 = vmul.f32 %v1471_v2, %v1522_v28  ;;  %v248_v42 = vmul.f32 %v1456_v0, %v1537_v36  ;;  %v1569_v55 = vld [vmem:[%s1466_s27 + $0xa8] sm:$0xff]  ;;  %v1604_v15 = vld [vmem:[%s1466_s27 + $0xb0] sm:$0xff] }
  0x24   : > { %v398_v43 = vrot.slane %v1530_v32, 1  ;;  %v1552_v44 = vadd.f32 %v321_v21, %v291_v33  ;;  %v305_v45 = vadd.f32 %v280_v34, %v250_v30  ;;  %v278_v46 = vmul.f32 %v1461_v1, %v1540_v37  ;;  %v1594_v10 = vld [vmem:[%s1466_s27 + $0x48] sm:$0xff]  ;;  %v1612_v25 = vld [vmem:[%s1466_s27 + $0x50] sm:$0xff] }
  0x25   : > { %v400_v47 = vrot.slane %v1545_v39, 1  ;;  %v1557_v48 = vadd.f32 %v334_v35, %v304_v40  ;;  %v333_v49 = vmul.f32 %v1471_v2, %v1543_v38  ;;  %v520_v4 = vrot.slane %v1530_v32, 2 }
  0x26   : > { %v397_v50 = vrot.slane %v1552_v44, 1  ;;  %v1562_v51 = vadd.f32 %v335_v41, %v305_v45  ;;  %v303_v52 = vadd.f32 %v278_v46, %v248_v42  ;;  %v519_v3 = vrot.slane %v1552_v44, 2  ;;  %v690_v46 = vld [vmem:[%s2110_s2] sm:$0xff] }
  0x27   : > { %v401_v53 = vsel %vm396_vm0, %v398_v43, %v400_v47  ;;  %v422_v54 = vrot.slane %v1557_v48, 1  ;;  %v544_v62 = vrot.slane %v1557_v48, 2  ;;  %v251_v5 = vmul.f32 %v1456_v0, %v1540_v37  ;;  %1140 = vmatprep.subr.mxu0 %v690_v46  ;;  %1180 = vmatprep.subr.mxu1 %v690_v46 }
  0x28   : > { %448 = vrot.lane.b32.xlu1 %v401_v53, %s1355_s6  ;;  %v399_v59 = vsel %vm396_vm0, %v397_v50, %v398_v43  ;;  %v424_v60 = vrot.slane %v1562_v51, 1  ;;  %v1580_v61 = vadd.f32 %v333_v49, %v303_v52  ;;  %v281_v9 = vmul.f32 %v1461_v1, %v1543_v38  ;;  %1141 = vmatpush3.msra.mxu0 %v690_v46 }
  0x29   : > { %446 = vrot.lane.b32.xlu0 %v399_v59, %s1355_s6  ;;  %v336_v14 = vmul.f32 %v1471_v2, %v1569_v55  ;;  %v546_v18 = vrot.slane %v1562_v51, 2  ;;  %v239_v20 = vmul.f32 %v1456_v0, %v1496_v16  ;;  %v269_v21 = vmul.f32 %v1461_v1, %v1499_v17  ;;  %1183 = vmatpush3.msra.mxu1 %v690_v46 }
  0x2a   : > { %v425_v11 = vsel %vm396_vm0, %v422_v54, %v424_v60  ;;  %v420_v12 = vrot.slane %v1580_v61, 1  ;;  %v542_v13 = vrot.slane %v1580_v61, 2  ;;  %v306_v19 = vadd.f32 %v281_v9, %v251_v5 }
  0x2b   : > { %v324_v31 = vmul.f32 %v1471_v2, %v1594_v10  ;;  %v252_v16 = vmul.f32 %v1456_v0, %v1513_v24  ;;  %v294_v34 = vadd.f32 %v269_v21, %v239_v20  ;;  %v282_v35 = vmul.f32 %v1461_v1, %v1519_v27 }
  0x2c   : > { %472 = vrot.lane.b32.xlu1 %v425_v11, %s1355_s6  ;;  %v423_v29 = vsel %vm396_vm0, %v420_v12, %v422_v54  ;;  %v545_v30 = vsel %vm518_vm1, %v542_v13, %v544_v62  ;;  %v1626_v33 = vadd.f32 %v336_v14, %v306_v19  ;;  %v337_v40 = vmul.f32 %v1471_v2, %v1604_v15  ;;  %v1673_v19 = vld [vmem:[%s1466_s27 + $0x58] sm:$0xff] }
  0x2d   : > { %470 = vrot.lane.b32.xlu0 %v423_v29, %s1355_s6  ;;  %v521_v41 = vsel %vm518_vm1, %v519_v3, %v520_v4  ;;  %v522_v42 = vrot.slane %v1545_v39, 2  ;;  %v295_v43 = vadd.f32 %v270_v57, %v240_v56  ;;  %v325_v45 = vmul.f32 %v1471_v2, %v1612_v25  ;;  %v1684_v29 = vld [vmem:[%s1466_s27 + $0xc0] sm:$0xff] }
  0x2e   : > { %v1639_v49 = vadd.f32 %v324_v31, %v294_v34  ;;  %v307_v50 = vadd.f32 %v282_v35, %v252_v16  ;;  %v547_v52 = vsel %vm518_vm1, %v544_v62, %v546_v18  ;;  %v426_v53 = vrot.slane %v1626_v33, 1  ;;  %v1658_v62 = vld [vmem:[%s1466_s27 + $0xb8] sm:$0xff] }
  0x2f   : > { %v253_v56 = vmul.f32 %v1456_v0, %v1516_v26  ;;  %v283_v57 = vmul.f32 %v1461_v1, %v1522_v28  ;;  %v523_v58 = vsel %vm518_vm1, %v520_v4, %v522_v42  ;;  %v1655_v63 = vadd.f32 %v325_v45, %v295_v43 }
  0x30   : > { %592 = vrot.lane.b32.xlu1 %v545_v30, %s1356_s11  ;;  %v1647_v54 = vadd.f32 %v337_v40, %v307_v50  ;;  %v402_v59 = vrot.slane %v1639_v49, 1  ;;  %v241_v3 = vmul.f32 %v1456_v0, %v1477_v6  ;;  %v271_v5 = vmul.f32 %v1461_v1, %v1483_v8 }
  0x31   : > { %568 = vrot.lane.b32.xlu0 %v521_v41, %s1356_s11  ;;  %v427_v4 = vsel %vm396_vm0, %v424_v60, %v426_v53  ;;  %v308_v11 = vadd.f32 %v283_v57, %v253_v56  ;;  %v338_v14 = vmul.f32 %v1471_v2, %v1658_v62  ;;  %v404_v20 = vrot.slane %v1655_v63, 1 }
  0x32   : > { %v428_v9 = vrot.slane %v1647_v54, 1  ;;  %v403_v6 = vsel %vm396_vm0, %v400_v47, %v402_v59  ;;  %v254_v21 = vmul.f32 %v1456_v0, %v1543_v38  ;;  %v284_v60 = vmul.f32 %v1461_v1, %v1569_v55 }
  0x33   : > { %v296_v30 = vadd.f32 %v271_v5, %v241_v3  ;;  %v326_v31 = vmul.f32 %v1471_v2, %v1673_v19  ;;  %v242_v16 = vmul.f32 %v1456_v0, %v1499_v17  ;;  %v272_v47 = vmul.f32 %v1461_v1, %v1594_v10 }
  0x34   : > { %594 = vrot.lane.b32.xlu1 %v547_v52, %s1356_s11  ;;  %v429_v38 = vsel %vm396_vm0, %v426_v53, %v428_v9  ;;  %v548_v34 = vrot.slane %v1626_v33, 2  ;;  %v1696_v35 = vadd.f32 %v338_v14, %v308_v11  ;;  %v405_v40 = vsel %vm396_vm0, %v402_v59, %v404_v20  ;;  %v1727_v14 = vld [vmem:[%s1466_s27 + $0xd8] sm:$0xff] }
  0x35   : > { %570 = vrot.lane.b32.xlu0 %v523_v58, %s1356_s11  ;;  %v524_v41 = vrot.slane %v1639_v49, 2  ;;  %v309_v43 = vadd.f32 %v284_v60, %v254_v21  ;;  %v339_v17 = vmul.f32 %v1471_v2, %v1684_v29  ;;  %v1703_v45 = vadd.f32 %v326_v31, %v296_v30 }
  0x36   : > { %v297_v46 = vadd.f32 %v272_v47, %v242_v16  ;;  %v327_v50 = vmul.f32 %v1471_v2, %v1537_v36  ;;  %v549_v52 = vsel %vm518_vm1, %v546_v18, %v548_v34  ;;  %v550_v53 = vrot.slane %v1647_v54, 2 }
  0x37   : > { %v526_v56 = vrot.slane %v1655_v63, 2  ;;  %v430_v57 = vrot.slane %v1696_v35, 1  ;;  %v525_v58 = vsel %vm518_vm1, %v522_v42, %v524_v41  ;;  %v1715_v59 = vadd.f32 %v339_v17, %v309_v43  ;;  %v228_v43 = vld [vmem:[%s1466_s27 + $0xe0] sm:$0xff] }
  0x38   : > { %474 = vrot.lane.b32.xlu1 %v427_v4, %s1355_s6  ;;  %v406_v3 = vrot.slane %v1703_v45, 1  ;;  %v1719_v5 = vadd.f32 %v327_v50, %v297_v46  ;;  %v225_v4 = vld [vmem:[%s1466_s27 + $0xc8] sm:$0xff]  ;;  %v255_v18 = vmul.f32 %v1456_v0, %v1519_v27  ;;  %v285_v11 = vmul.f32 %v1461_v1, %v1604_v15 }
  0x39   : > { %450 = vrot.lane.b32.xlu0 %v403_v6, %s1355_s6  ;;  %v551_v42 = vsel %vm518_vm1, %v548_v34, %v550_v53  ;;  %v527_v6 = vsel %vm518_vm1, %v524_v41, %v526_v56  ;;  %v431_v21 = vsel %vm396_vm0, %v428_v9, %v430_v57  ;;  %v243_v60 = vmul.f32 %v1456_v0, %v1480_v7 }
  0x3a   : > { %v432_v30 = vrot.slane %v1715_v59, 1  ;;  %v273_v27 = vmul.f32 %v1461_v1, %v1612_v25  ;;  %v257_v31 = vmul.f32 %v1456_v0, %v1569_v55  ;;  %v287_v16 = vmul.f32 %v1461_v1, %v1684_v29 }
  0x3b   : > { %v552_v47 = vrot.slane %v1696_v35, 2  ;;  %v340_v9 = vmul.f32 %v1471_v2, %v225_v4  ;;  %v342_v7 = vmul.f32 %v1471_v2, %v1727_v14  ;;  %v407_v34 = vsel %vm396_vm0, %v404_v20, %v406_v3 }
  0x3c   : > { %476 = vrot.lane.b32.xlu1 %v429_v38, %s1355_s6  ;;  %v528_v38 = vrot.slane %v1703_v45, 2  ;;  %v310_v41 = vadd.f32 %v285_v11, %v255_v18  ;;  %v312_v55 = vadd.f32 %v287_v16, %v257_v31  ;;  %v245_v17 = vmul.f32 %v1456_v0, %v1594_v10  ;;  %v229_v31 = vld [vmem:[%s1466_s27 + $0xe8] sm:$0xff] }
  0x3d   : > { %452 = vrot.lane.b32.xlu0 %v405_v40, %s1355_s6  ;;  %v408_v40 = vrot.slane %v1719_v5, 1  ;;  %v275_v46 = vmul.f32 %v1461_v1, %v1537_v36  ;;  %v330_v50 = vmul.f32 %v1471_v2, %v1540_v37  ;;  %v258_v20 = vmul.f32 %v1456_v0, %v1604_v15 }
  0x3e   : > { %v328_v18 = vmul.f32 %v1471_v2, %v1507_v22  ;;  %v256_v10 = vmul.f32 %v1456_v0, %v1522_v28  ;;  %v1767_v36 = vadd.f32 %v342_v7, %v312_v55  ;;  %v288_v37 = vmul.f32 %v1461_v1, %v225_v4  ;;  %v226_v4 = vld [vmem:[%s1466_s27 + $0xd0] sm:$0xff] }
  0x3f   : > { %v300_v11 = vadd.f32 %v275_v46, %v245_v17  ;;  %v409_v15 = vsel %vm396_vm0, %v406_v3, %v408_v40  ;;  %v246_v28 = vmul.f32 %v1456_v0, %v1612_v25  ;;  %v331_v3 = vmul.f32 %v1471_v2, %v1513_v24 }
  0x40   : > { %596 = vrot.lane.b32.xlu1 %v549_v52, %s1356_s11  ;;  %v433_v52 = vsel %vm396_vm0, %v430_v57, %v432_v30  ;;  %v286_v57 = vmul.f32 %v1461_v1, %v1658_v62  ;;  %v274_v16 = vmul.f32 %v1461_v1, %v1673_v19  ;;  %v289_v7 = vmul.f32 %v1461_v1, %v226_v4 }
  0x41   : > { %572 = vrot.lane.b32.xlu0 %v525_v58, %s1356_s11  ;;  %v298_v58 = vadd.f32 %v273_v27, %v243_v60  ;;  %v244_v60 = vmul.f32 %v1456_v0, %v1483_v8  ;;  %v313_v27 = vadd.f32 %v288_v37, %v258_v20  ;;  %v529_v8 = vsel %vm518_vm1, %v526_v56, %v528_v38  ;;  %v230_v37 = vld [vmem:[%s1466_s27 + $0xf0] sm:$0xff]  ;;  %s983_s27 = smul.u32 24, %s1337_s15  ;;  %s2056_s15 = scalar_lea.sflag [#allocation3], %s186_s20 }
  0x42   : > { %v554_v55 = vrot.slane %v1715_v59, 2  ;;  %v344_v46 = vmul.f32 %v1471_v2, %v229_v31  ;;  %v311_v56 = vadd.f32 %v286_v57, %v256_v10  ;;  %v341_v20 = vmul.f32 %v1471_v2, %v226_v4 }
  0x43   : > { %s988_s29 = sadd.s32 %s1186_s28, %s983_s27 }
  0x44   : > { %598 = vrot.lane.b32.xlu1 %v551_v42, %s1356_s11  ;;  %v343_v42 = vmul.f32 %v1471_v2, %v228_v43  ;;  %v1803_v43 = vadd.f32 %v340_v9, %v310_v41  ;;  %v247_v41 = vmul.f32 %v1456_v0, %v1673_v19  ;;  %v1830_v57 = vadd.f32 %v341_v20, %v311_v56  ;;  %s1106_s5 = sshll.u32 %s988_s29, 7 }
  0x45   : > { %574 = vrot.lane.b32.xlu0 %v527_v6, %s1356_s11  ;;  %v276_v6 = vmul.f32 %v1461_v1, %v1507_v22  ;;  %v259_v22 = vmul.f32 %v1456_v0, %v1658_v62  ;;  %s2050_s9 = scalar_lea.hbm %s2111_s3, %s1106_s5 }
  0x46   : > { %v1800_v24 = vadd.f32 %v343_v42, %v313_v27  ;;  %v277_v42 = vmul.f32 %v1461_v1, %v1510_v23  ;;  %v434_v10 = vrot.slane %v1803_v43, 1 }
  0x47   : > { %v301_v25 = vadd.f32 %v276_v6, %v246_v28  ;;  %v314_v62 = vadd.f32 %v289_v7, %v259_v22  ;;  %v345_v28 = vmul.f32 %v1471_v2, %v230_v37  ;;  %v556_v7 = vrot.slane %v1803_v43, 2 }
  0x48   : > { %478 = vrot.lane.b32.xlu1 %v431_v21, %s1355_s6  ;;  %v1785_v21 = vadd.f32 %v330_v50, %v300_v11  ;;  %v1810_v50 = vadd.f32 %v328_v18, %v298_v58  ;;  %v299_v11 = vadd.f32 %v274_v16, %v244_v60  ;;  %v332_v58 = vmul.f32 %v1471_v2, %v1516_v26 }
  0x49   : > { %454 = vrot.lane.b32.xlu0 %v407_v34, %s1355_s6  ;;  %v553_v34 = vsel %vm518_vm1, %v550_v53, %v552_v47  ;;  %v1805_v17 = vadd.f32 %v331_v3, %v301_v25  ;;  %v530_v53 = vrot.slane %v1719_v5, 2  ;;  %v1815_v9 = vadd.f32 %v344_v46, %v314_v62 }
  0x4a   : > { %v555_v18 = vsel %vm518_vm1, %v552_v47, %v554_v55  ;;  %v302_v19 = vadd.f32 %v277_v42, %v247_v41  ;;  %v410_v47 = vrot.slane %v1810_v50, 1  ;;  %v558_v46 = vrot.slane %v1830_v57, 2 }
  0x4b   : > { %v531_v26 = vsel %vm518_vm1, %v528_v38, %v530_v53  ;;  %v442_v3 = vrot.slane %v1815_v9, 1  ;;  %v564_v16 = vrot.slane %v1815_v9, 2  ;;  %v414_v37 = vrot.slane %v1785_v21, 1 }
  0x4c   : > { %480 = vrot.lane.b32.xlu1 %v433_v52, %s1355_s6  ;;  %v329_v52 = vmul.f32 %v1471_v2, %v1510_v23  ;;  %v290_v23 = vmul.f32 %v1461_v1, %v1727_v14  ;;  %v1841_v4 = vadd.f32 %v332_v58, %v302_v19  ;;  %v435_v1 = vsel %vm396_vm0, %v432_v30, %v434_v10 }
  0x4d   : > { %456 = vrot.lane.b32.xlu0 %v409_v15, %s1355_s6  ;;  %v260_v15 = vmul.f32 %v1456_v0, %v1684_v29  ;;  %v436_v2 = vrot.slane %v1830_v57, 1  ;;  %v411_v38 = vsel %vm396_vm0, %v408_v40, %v410_v47  ;;  %v416_v58 = vrot.slane %v1805_v17, 1 }
  0x4e   : > { %v1839_v6 = vadd.f32 %v329_v52, %v299_v11  ;;  %v418_v29 = vrot.slane %v1841_v4, 1  ;;  %v540_v27 = vrot.slane %v1841_v4, 2  ;;  %v559_v11 = vsel %vm518_vm1, %v556_v7, %v558_v46 }
  0x4f   : > { %v315_v0 = vadd.f32 %v290_v23, %v260_v15  ;;  %v437_v22 = vsel %vm396_vm0, %v434_v10, %v436_v2  ;;  %v438_v52 = vrot.slane %v1767_v36, 1  ;;  %v560_v10 = vrot.slane %v1767_v36, 2 }
  0x50   : > { %600 = vrot.lane.b32.xlu1 %v553_v34, %s1356_s11  ;;  %v412_v60 = vrot.slane %v1839_v6, 1  ;;  %v421_v30 = vsel %vm396_vm0, %v418_v29, %v420_v12  ;;  %v543_v40 = vsel %vm518_vm1, %v540_v27, %v542_v13  ;;  %v532_v12 = vrot.slane %v1810_v50, 2 }
  0x51   : > { %576 = vrot.lane.b32.xlu0 %v529_v8, %s1356_s11  ;;  %v370_v14 = vadd.f32 %v345_v28, %v315_v0  ;;  %v557_v13 = vsel %vm518_vm1, %v554_v55, %v556_v7  ;;  %v534_v20 = vrot.slane %v1839_v6, 2  ;;  %v439_v55 = vsel %vm396_vm0, %v436_v2, %v438_v52 }
  0x52   : > { %v413_v8 = vsel %vm396_vm0, %v410_v47, %v412_v60  ;;  %v533_v56 = vsel %vm518_vm1, %v530_v53, %v532_v12  ;;  %v440_v53 = vrot.slane %v1800_v24, 1  ;;  %v415_v42 = vsel %vm396_vm0, %v412_v60, %v414_v37 }
  0x53   : > { %v444_v31 = vrot.slane %v370_v14, 1  ;;  %v566_v25 = vrot.slane %v370_v14, 2  ;;  %v535_v41 = vsel %vm518_vm1, %v532_v12, %v534_v20  ;;  %v417_v15 = vsel %vm396_vm0, %v414_v37, %v416_v58 }
  0x54   : > { %602 = vrot.lane.b32.xlu1 %v555_v18, %s1356_s11  ;;  %v441_v18 = vsel %vm396_vm0, %v438_v52, %v440_v53  ;;  %v536_v19 = vrot.slane %v1785_v21, 2  ;;  %v561_v23 = vsel %vm518_vm1, %v558_v46, %v560_v10  ;;  %v562_v28 = vrot.slane %v1800_v24, 2 }
  0x55   : > { %578 = vrot.lane.b32.xlu0 %v531_v26, %s1356_s11  ;;  %v445_v34 = vsel %vm396_vm0, %v442_v3, %v444_v31  ;;  %v567_v62 = vsel %vm518_vm1, %v564_v16, %v566_v25  ;;  %v538_v47 = vrot.slane %v1805_v17, 2  ;;  %v443_v2 = vsel %vm396_vm0, %v440_v53, %v442_v3 }
  0x56   : > { %v537_v26 = vsel %vm518_vm1, %v534_v20, %v536_v19  ;;  %v563_v0 = vsel %vm518_vm1, %v560_v10, %v562_v28  ;;  %v419_v14 = vsel %vm396_vm0, %v416_v58, %v418_v29 }
  0x57   : > { %v541_v60 = vsel %vm518_vm1, %v538_v47, %v540_v27 }
  0x58   : > { %482 = vrot.lane.b32.xlu1 %v435_v1, %s1355_s6  ;;  %v539_v1 = vsel %vm518_vm1, %v536_v19, %v538_v47 }
  0x59   : > { %458 = vrot.lane.b32.xlu0 %v411_v38, %s1355_s6  ;;  %v565_v38 = vsel %vm518_vm1, %v562_v28, %v564_v16 }
  0x5c   : > { %484 = vrot.lane.b32.xlu1 %v437_v22, %s1355_s6 }
  0x5d   : > { %460 = vrot.lane.b32.xlu0 %v413_v8, %s1355_s6 }
  0x60   : > { %604 = vrot.lane.b32.xlu1 %v557_v13, %s1356_s11 }
  0x61   : > { %580 = vrot.lane.b32.xlu0 %v533_v56, %s1356_s11 }
  0x64   : > { %606 = vrot.lane.b32.xlu1 %v559_v11, %s1356_s11 }
  0x65   : > { %582 = vrot.lane.b32.xlu0 %v535_v41, %s1356_s11 }
  0x68   : > { %486 = vrot.lane.b32.xlu1 %v439_v55, %s1355_s6 }
  0x69   : > { %462 = vrot.lane.b32.xlu0 %v415_v42, %s1355_s6 }
  0x6c   : > { %488 = vrot.lane.b32.xlu1 %v441_v18, %s1355_s6 }
  0x6d   : > { %464 = vrot.lane.b32.xlu0 %v417_v15, %s1355_s6 }
  0x70   : > { %608 = vrot.lane.b32.xlu1 %v561_v23, %s1356_s11 }
  0x71   : > { %584 = vrot.lane.b32.xlu0 %v537_v26, %s1356_s11 }
  0x74   : > { %610 = vrot.lane.b32.xlu1 %v563_v0, %s1356_s11 }
  0x75   : > { %586 = vrot.lane.b32.xlu0 %v539_v1, %s1356_s11 }
  0x78   : > { %490 = vrot.lane.b32.xlu1 %v443_v2, %s1355_s6 }
  0x79   : > { %466 = vrot.lane.b32.xlu0 %v419_v14, %s1355_s6 }
  0x7c   : > { %492 = vrot.lane.b32.xlu1 %v445_v34, %s1355_s6 }
  0x7d   : > { %468 = vrot.lane.b32.xlu0 %v421_v30, %s1355_s6 }
  0x80   : > { %612 = vrot.lane.b32.xlu1 %v565_v38, %s1356_s11 }
  0x81   : > { %588 = vrot.lane.b32.xlu0 %v541_v60, %s1356_s11 }
  0x84   : > { %614 = vrot.lane.b32.xlu1 %v567_v62, %s1356_s11 }
  0x85   : > { %590 = vrot.lane.b32.xlu0 %v543_v40, %s1356_s11  ;;  %s1265_s11 = sshll.u32 %s1357_s10, 4  ;;  %s1266_s11 = int_to_ptr.vmem [resolvable:$false] %s1265_s11 }
  0x86   : > { %s1267_s21 = scalar_lea.vmem %s1266_s11, 6144  ;;  %p1268_p4 = scmp.lt.s32.totalorder %s2044_s4, %s1266_s11 }
  0x87   : > { %p1269_p5 = scmp.lt.s32.totalorder %s1267_s21, %s1261_s16 }
  0x89   : > { %p1270_p6 = por %p1269_p5, %p1268_p4 }
  0x8b   : > { %p1271_p7 = pnand %p1270_p6, %p1264_p2 }
  0x9a   : > { %v449_v29 = vpop.permute.xlu1 %448 }
  0x9b   : > { %v447_v3 = vpop.permute.xlu0 %446 }
  0x9c   : > { %v641_v27 = vsel %vm640_vm2, %v1552_v44, %v447_v3 }
  0x9e   : > { %v473_v31 = vpop.permute.xlu1 %472 }
  0x9f   : > { %v471_v25 = vpop.permute.xlu0 %470  ;;  %v654_v40 = vsel %vm640_vm2, %v1557_v48, %v473_v31 }
  0xa0   : > { %v653_v30 = vsel %vm640_vm2, %v1580_v61, %v471_v25  ;;  %v642_v61 = vsel %vm640_vm2, %v1530_v32, %v449_v29 }
  0xa2   : > { %v593_v16 = vpop.permute.xlu1 %592 }
  0xa3   : > { %v569_v22 = vpop.permute.xlu0 %568  ;;  %v678_v7 = vsel %vm665_vm3, %v653_v30, %v593_v16 }
  0xa4   : > { %v666_v34 = vsel %vm665_vm3, %v641_v27, %v569_v22  ;;  %1160 = vmatprep.mubr.msk.f32.mxu1 %vm693_vm4, %v678_v7 }
  0xa5   : > { %1142 = vmatprep.mubr.msk.f32.mxu0 %vm693_vm4, %v666_v34 }
  0xa6   : > { %v595_v8 = vpop.permute.xlu1 %594 }
  0xa7   : > { %v679_v12 = vsel %vm665_vm3, %v654_v40, %v595_v8  ;;  %v571_v62 = vpop.permute.xlu0 %570 }
  0xa8   : > { %v667_v44 = vsel %vm665_vm3, %v642_v61, %v571_v62  ;;  %1161 = vmatmul.mubr.msk.f32.vlgmr.msra.gmra.mxu1 %vm693_vm4, %v679_v12 }
  0xa9   : > { %1143 = vmatmul.mubr.msk.f32.vlgmr.msra.gmra.mxu0 %vm693_vm4, %v667_v44 }
  0xaa   : > { %v475_v13 = vpop.permute.xlu1 %474 }
  0xab   : > { %v451_v46 = vpop.permute.xlu0 %450  ;;  %v655_v48 = vsel %vm640_vm2, %v1562_v51, %v475_v13 }
  0xac   : > { %v643_v32 = vsel %vm640_vm2, %v1545_v39, %v451_v46 }
  0xae   : > { %v477_v56 = vpop.permute.xlu1 %476 }
  0xaf   : > { %v453_v20 = vpop.permute.xlu0 %452  ;;  %v656_v55 = vsel %vm640_vm2, %v1626_v33, %v477_v56 }
  0xb0   : > { %v644_v51 = vsel %vm640_vm2, %v1639_v49, %v453_v20 }
  0xb2   : > { %v597_v11 = vpop.permute.xlu1 %596 }
  0xb3   : > { %v680_v52 = vsel %vm665_vm3, %v655_v48, %v597_v11  ;;  %v573_v41 = vpop.permute.xlu0 %572 }
  0xb4   : > { %v668_v37 = vsel %vm665_vm3, %v643_v32, %v573_v41  ;;  %1163 = vmatprep.mubr.msk.f32.mxu1 %vm693_vm4, %v680_v52 }
  0xb5   : > { %1145 = vmatprep.mubr.msk.f32.mxu0 %vm693_vm4, %v668_v37 }
  0xb6   : > { %v599_v53 = vpop.permute.xlu1 %598 }
  0xb7   : > { %v681_v42 = vsel %vm665_vm3, %v656_v55, %v599_v53  ;;  %v575_v58 = vpop.permute.xlu0 %574 }
  0xb8   : > { %v669_v39 = vsel %vm665_vm3, %v644_v51, %v575_v58  ;;  %1164 = vmatmul.mubr.msk.f32.gmra.mxu1 %vm693_vm4, %v681_v42 }
  0xb9   : > { %1146 = vmatmul.mubr.msk.f32.gmra.mxu0 %vm693_vm4, %v669_v39 }
  0xba   : > { %v479_v18 = vpop.permute.xlu1 %478 }
  0xbb   : > { %v455_v10 = vpop.permute.xlu0 %454  ;;  %v657_v33 = vsel %vm640_vm2, %v1647_v54, %v479_v18 }
  0xbc   : > { %v645_v49 = vsel %vm640_vm2, %v1655_v63, %v455_v10 }
  0xbe   : > { %v481_v15 = vpop.permute.xlu1 %480 }
  0xbf   : > { %v457_v19 = vpop.permute.xlu0 %456  ;;  %v658_v0 = vsel %vm640_vm2, %v1696_v35, %v481_v15 }
  0xc0   : > { %v646_v54 = vsel %vm640_vm2, %v1703_v45, %v457_v19 }
  0xc2   : > { %v601_v23 = vpop.permute.xlu1 %600 }
  0xc3   : > { %v682_v28 = vsel %vm665_vm3, %v657_v33, %v601_v23  ;;  %v577_v26 = vpop.permute.xlu0 %576 }
  0xc4   : > { %v670_v47 = vsel %vm665_vm3, %v645_v49, %v577_v26  ;;  %1166 = vmatprep.mubr.msk.f32.mxu1 %vm693_vm4, %v682_v28 }
  0xc5   : > { %1148 = vmatprep.mubr.msk.f32.mxu0 %vm693_vm4, %v670_v47 }
  0xc6   : > { %v603_v1 = vpop.permute.xlu1 %602 }
  0xc7   : > { %v683_v2 = vsel %vm665_vm3, %v658_v0, %v603_v1  ;;  %v579_v14 = vpop.permute.xlu0 %578 }
  0xc8   : > { %v671_v63 = vsel %vm665_vm3, %v646_v54, %v579_v14  ;;  %1167 = vmatmul.mubr.msk.f32.gmra.mxu1 %vm693_vm4, %v683_v2 }
  0xc9   : > { %1149 = vmatmul.mubr.msk.f32.gmra.mxu0 %vm693_vm4, %v671_v63 }
  0xca   : > { %v483_v38 = vpop.permute.xlu1 %482 }
  0xcb   : > { %v459_v60 = vpop.permute.xlu0 %458  ;;  %v659_v35 = vsel %vm640_vm2, %v1715_v59, %v483_v38 }
  0xcc   : > { %v647_v45 = vsel %vm640_vm2, %v1719_v5, %v459_v60 }
  0xce   : > { %v485_v29 = vpop.permute.xlu1 %484 }
  0xcf   : > { %v461_v3 = vpop.permute.xlu0 %460  ;;  %v660_v27 = vsel %vm640_vm2, %v1803_v43, %v485_v29 }
  0xd0   : > { %v648_v59 = vsel %vm640_vm2, %v1810_v50, %v461_v3 }
  0xd2   : > { %v605_v31 = vpop.permute.xlu1 %604 }
  0xd3   : > { %v684_v25 = vsel %vm665_vm3, %v659_v35, %v605_v31  ;;  %v581_v30 = vpop.permute.xlu0 %580 }
  0xd4   : > { %v672_v16 = vsel %vm665_vm3, %v647_v45, %v581_v30  ;;  %1169 = vmatprep.mubr.msk.f32.mxu1 %vm693_vm4, %v684_v25 }
  0xd5   : > { %1151 = vmatprep.mubr.msk.f32.mxu0 %vm693_vm4, %v672_v16 }
  0xd6   : > { %v607_v22 = vpop.permute.xlu1 %606 }
  0xd7   : > { %v685_v7 = vsel %vm665_vm3, %v660_v27, %v607_v22  ;;  %v583_v34 = vpop.permute.xlu0 %582 }
  0xd8   : > { %v673_v5 = vsel %vm665_vm3, %v648_v59, %v583_v34  ;;  %1170 = vmatmul.mubr.msk.f32.gmra.mxu1 %vm693_vm4, %v685_v7 }
  0xd9   : > { %1152 = vmatmul.mubr.msk.f32.gmra.mxu0 %vm693_vm4, %v673_v5 }
  0xda   : > { %v487_v40 = vpop.permute.xlu1 %486 }
  0xdb   : > { %v463_v8 = vpop.permute.xlu0 %462  ;;  %v661_v43 = vsel %vm640_vm2, %v1830_v57, %v487_v40 }
  0xdc   : > { %v649_v50 = vsel %vm640_vm2, %v1839_v6, %v463_v8 }
  0xde   : > { %v489_v61 = vpop.permute.xlu1 %488 }
  0xdf   : > { %v465_v12 = vpop.permute.xlu0 %464  ;;  %v662_v56 = vsel %vm640_vm2, %v1767_v36, %v489_v61 }
  0xe0   : > { %v650_v57 = vsel %vm640_vm2, %v1785_v21, %v465_v12 }
  0xe2   : > { %v609_v62 = vpop.permute.xlu1 %608 }
  0xe3   : > { %v686_v44 = vsel %vm665_vm3, %v661_v43, %v609_v62  ;;  %v585_v13 = vpop.permute.xlu0 %584 }
  0xe4   : > { %v674_v46 = vsel %vm665_vm3, %v649_v50, %v585_v13  ;;  %1172 = vmatprep.mubr.msk.f32.mxu1 %vm693_vm4, %v686_v44 }
  0xe5   : > { %1154 = vmatprep.mubr.msk.f32.mxu0 %vm693_vm4, %v674_v46 }
  0xe6   : > { %v611_v20 = vpop.permute.xlu1 %610 }
  0xe7   : > { %v687_v48 = vsel %vm665_vm3, %v662_v56, %v611_v20  ;;  %v587_v11 = vpop.permute.xlu0 %586 }
  0xe8   : > { %v675_v6 = vsel %vm665_vm3, %v650_v57, %v587_v11  ;;  %1173 = vmatmul.mubr.msk.f32.gmra.mxu1 %vm693_vm4, %v687_v48 }
  0xe9   : > { %1155 = vmatmul.mubr.msk.f32.gmra.mxu0 %vm693_vm4, %v675_v6 }
  0xea   : > { %v491_v32 = vpop.permute.xlu1 %490 }
  0xeb   : > { %v467_v52 = vpop.permute.xlu0 %466  ;;  %v663_v36 = vsel %vm640_vm2, %v1800_v24, %v491_v32 }
  0xec   : > { %v651_v21 = vsel %vm640_vm2, %v1805_v17, %v467_v52 }
  0xee   : > { %v493_v41 = vpop.permute.xlu1 %492 }
  0xef   : > { %v469_v37 = vpop.permute.xlu0 %468  ;;  %v664_v58 = vsel %vm640_vm2, %v1815_v9, %v493_v41 }
  0xf0   : > { %v652_v24 = vsel %vm640_vm2, %v1841_v4, %v469_v37 }
  0xf2   : > { %v613_v55 = vpop.permute.xlu1 %612 }
  0xf3   : > { %v688_v53 = vsel %vm665_vm3, %v663_v36, %v613_v55  ;;  %v589_v51 = vpop.permute.xlu0 %588 }
  0xf4   : > { %v676_v42 = vsel %vm665_vm3, %v651_v21, %v589_v51  ;;  %1175 = vmatprep.mubr.msk.f32.mxu1 %vm693_vm4, %v688_v53 }
  0xf5   : > { %1157 = vmatprep.mubr.msk.f32.mxu0 %vm693_vm4, %v676_v42 }
  0xf6   : > { %v615_v39 = vpop.permute.xlu1 %614 }
  0xf7   : > { %v689_v18 = vsel %vm665_vm3, %v664_v58, %v615_v39  ;;  %v591_v10 = vpop.permute.xlu0 %590 }
  0xf8   : > { %v677_v17 = vsel %vm665_vm3, %v652_v24, %v591_v10  ;;  %1176 = vmatmul.mubr.msk.f32.gmra.mxu1 %vm693_vm4, %v689_v18 }
  0xf9   : > { %1158 = vmatmul.mubr.msk.f32.gmra.mxu0 %vm693_vm4, %v677_v17 }
 0x168   : > { %v1162_v15 = vpop.f32.mrf.mxu1 }
 0x169   : > { %v1144_v19 = vpop.f32.mrf.mxu0  ;;  %964 = vst [vmem:[%s2018_s24 + $0x68] sm:$0xff] %v1162_v15 }
 0x16a   : > { %952 = vst [vmem:[%s2018_s24 + $0x8] sm:$0xff] %v1144_v19  ;;  %v892_v9 = vpop.f32.mrf.mxu1 }
 0x16b   : > { %v832_v4 = vpop.f32.mrf.mxu0  ;;  %963 = vst [vmem:[%s2018_s24 + $0x60] sm:$0xff] %v892_v9 }
 0x16c   : > { %951 = vst [vmem:[%s2018_s24] sm:$0xff] %v832_v4 }
 0x178   : > { %v1165_v33 = vpop.f32.mrf.mxu1 }
 0x179   : > { %v1147_v23 = vpop.f32.mrf.mxu0  ;;  %966 = vst [vmem:[%s2018_s24 + $0x78] sm:$0xff] %v1165_v33 }
 0x17a   : > { %954 = vst [vmem:[%s2018_s24 + $0x18] sm:$0xff] %v1147_v23  ;;  %v902_v49 = vpop.f32.mrf.mxu1 }
 0x17b   : > { %v842_v28 = vpop.f32.mrf.mxu0  ;;  %965 = vst [vmem:[%s2018_s24 + $0x70] sm:$0xff] %v902_v49 }
 0x17c   : > { %953 = vst [vmem:[%s2018_s24 + $0x10] sm:$0xff] %v842_v28 }
 0x188   : > { %v1168_v26 = vpop.f32.mrf.mxu1 }
 0x189   : > { %v1150_v47 = vpop.f32.mrf.mxu0  ;;  %968 = vst [vmem:[%s2018_s24 + $0x88] sm:$0xff] %v1168_v26 }
 0x18a   : > { %956 = vst [vmem:[%s2018_s24 + $0x28] sm:$0xff] %v1150_v47  ;;  %v912_v0 = vpop.f32.mrf.mxu1 }
 0x18b   : > { %v852_v1 = vpop.f32.mrf.mxu0  ;;  %967 = vst [vmem:[%s2018_s24 + $0x80] sm:$0xff] %v912_v0 }
 0x18c   : > { %955 = vst [vmem:[%s2018_s24 + $0x20] sm:$0xff] %v852_v1 }
 0x198   : > { %v1171_v54 = vpop.f32.mrf.mxu1 }
 0x199   : > { %v1153_v2 = vpop.f32.mrf.mxu0  ;;  %970 = vst [vmem:[%s2018_s24 + $0x98] sm:$0xff] %v1171_v54 }
 0x19a   : > { %958 = vst [vmem:[%s2018_s24 + $0x38] sm:$0xff] %v1153_v2  ;;  %v922_v14 = vpop.f32.mrf.mxu1 }
 0x19b   : > { %v862_v63 = vpop.f32.mrf.mxu0  ;;  %969 = vst [vmem:[%s2018_s24 + $0x90] sm:$0xff] %v922_v14 }
 0x19c   : > { %957 = vst [vmem:[%s2018_s24 + $0x30] sm:$0xff] %v862_v63 }
 0x1a8   : > { %v1174_v38 = vpop.f32.mrf.mxu1 }
 0x1a9   : > { %v1156_v60 = vpop.f32.mrf.mxu0  ;;  %972 = vst [vmem:[%s2018_s24 + $0xa8] sm:$0xff] %v1174_v38 }
 0x1aa   : > { %960 = vst [vmem:[%s2018_s24 + $0x48] sm:$0xff] %v1156_v60  ;;  %v932_v29 = vpop.f32.mrf.mxu1 }
 0x1ab   : > { %v872_v3 = vpop.f32.mrf.mxu0  ;;  %971 = vst [vmem:[%s2018_s24 + $0xa0] sm:$0xff] %v932_v29 }
 0x1ac   : > { %959 = vst [vmem:[%s2018_s24 + $0x40] sm:$0xff] %v872_v3 }
 0x1b8   : > { %v1177_v35 = vpop.f32.mrf.mxu1 }
 0x1b9   : > { %v1159_v31 = vpop.f32.mrf.mxu0  ;;  %974 = vst [vmem:[%s2018_s24 + $0xb8] sm:$0xff] %v1177_v35 }
 0x1ba   : > { %962 = vst [vmem:[%s2018_s24 + $0x58] sm:$0xff] %v1159_v31  ;;  %v942_v45 = vpop.f32.mrf.mxu1 }
 0x1bb   : > { %v882_v25 = vpop.f32.mrf.mxu0  ;;  %973 = vst [vmem:[%s2018_s24 + $0xb0] sm:$0xff] %v942_v45 }
 0x1bc   : > { %961 = vst [vmem:[%s2018_s24 + $0x50] sm:$0xff] %v882_v25 }
 0x1bd   : > { %1274 = shalt.err (!%p1271_p7)
}
 0x1be   : > { %s1275_s20 = scalar_lea.hbm %s2050_s9, 3072  ;;  %s1279_s28 = scalar_lea.hbm %s2111_s3, 12288 }
 0x1bf   : > { %p1276_p9 = scmp.ne.s32.totalorder %s2050_s9, %s1275_s20  ;;  %p1280_p12 = scmp.lt.s32.totalorder %s2050_s9, %s2111_s3 }
 0x1c0   : > { %p1281_p13 = scmp.lt.s32.totalorder %s1279_s28, %s1275_s20 }
 0x1c1   : > { %p1277_p10 = pnand %p1276_p9, %p1430_p3 }
 0x1c2   : > { %p1282_p0 = por %p1281_p13, %p1280_p12 }
 0x1c3   : > { %p1278_p11 = pneg %p1277_p10 }
 0x1c5   : > { %p1283_p1 = pnand %p1282_p0, %p1278_p11 }
 0x1c7   : > { %1286 = shalt.err (!%p1283_p1)
}
 0x1c8   : > { %s1358_s7 = smov 128  }
 0x1c9   : > { %1187 = dma.vmem_to_hbm [thread:$0]  (%p1430_p3), %s2044_s4, 3072, %s2050_s9, %s2056_s15, %s1358_s7, %s1358_s7, %s1355_s6  }
 0x1ca PF: > { %p1193_p2 = scmp.ge.s32.totalorder %s1353_s19, 2  ;;  %s1006_s8 = sand.u32 1, %s1325_s12  }
 0x1cb   : > { %s1007_s16 = scalar_lea.sflag [#allocation3], %s1006_s8 }
 0x1cc   : > { %p1190_p4 = pnand %p1193_p2, %p1439_p8 }
 0x1ce   : > { %p1191_p5 = pneg %p1190_p4 }
 0x1d0   : > { %1320 = dma.done.wait (%p1191_p5), %s1007_s16, 3072  }
 0x1d1   : > { %1322 = vsyncadd (%p1191_p5), %s1007_s16, 4294964224  ;;  %s16_s19 = sadd.s32 1, %s1353_s19   ;;  %s2114_s12 = smov %s1329_s13 }
 0x1d2   : > { %p13_p6 = scmp.ge.s32.totalorder %s16_s19, 6   ;;  %s2115_s13 = smov %s1333_s14 }
 0x1d3   : > { %s2116_s14 = smov %s1448_s30  ;;  %s2117_s15 = smov %s1345_s17 }
 0x1d4   : > { %s2118_s16 = smov %s1349_s18  ;;  %s2119_s17 = smov %s2122_s22 }
 0x1d5   : > { %s2120_s18 = smov %s2126_s23  ;;  %15 = sbr.rel (!%p13_p6) target bundleno = 5 (0x5), region = 67 }
 0x1da   :  { %1012 = vsyncpa [#allocation3], 1 }
 0x1db   :  { %1014 = vsyncpa [#allocation3 + $0x1], 1 }

</bundles_post_ra>
